<compile_context>
chip_gen: v5e
topology: v5e:2x2
jax: 0.10.0
libtpu: 0.0.40
codegen_flags: <defaults>
</compile_context>

<pallas_src>
import functools

import jax
import jax.numpy as jnp
from jax.experimental import pallas as pl
from jax.experimental.pallas import tpu as pltpu


# ----------------------------------------------------------------------------
# Fused 3-layer MLP kernel: out = relu(relu(z@W1+b1)@W2+b2)@W3+b3
# ----------------------------------------------------------------------------
def mlp3_kernel(z_ref, w1_ref, b1_ref, w2_ref, b2_ref, w3_ref, b3_ref, o_ref,
                *, mxu_dtype):
    z = z_ref[...].astype(mxu_dtype)                          # [TM, Fp]
    h = jnp.dot(z, w1_ref[...],
                preferred_element_type=jnp.float32) + b1_ref[...]
    h = jnp.maximum(h, 0.0)                                   # ReLU (f32, VPU)
    h = jnp.dot(h.astype(mxu_dtype), w2_ref[...],
                preferred_element_type=jnp.float32) + b2_ref[...]
    h = jnp.maximum(h, 0.0)                                   # ReLU (f32, VPU)
    out = jnp.dot(h.astype(mxu_dtype), w3_ref[...],
                  preferred_element_type=jnp.float32) + b3_ref[...]
    o_ref[...] = out.astype(o_ref.dtype)                      # lane-dense store


def _round_up(n, m):
    return ((n + m - 1) // m) * m


def _pad2(x, rows, cols):
    r, c = x.shape
    return jnp.pad(x, ((0, rows - r), (0, cols - c)))


# ----------------------------------------------------------------------------
# Wrapper: pad to lane-dense shapes, tile the batch, call the fused kernel
# ----------------------------------------------------------------------------
@functools.partial(jax.jit, static_argnames=("block_rows", "mxu_dtype"))
def classification_head_forward(z, params, *, block_rows=128,
                                mxu_dtype=jnp.float32):
    B, F = z.shape
    H = params["W1"].shape[1]
    O = params["W3"].shape[1]

    LANE = 128
    Fp = _round_up(F, LANE)                     # lane-dense feature dims
    Hp = _round_up(H, LANE)
    Op = _round_up(O, LANE)
    TM = min(block_rows, _round_up(B, 8))       # row block (multiple of 8)
    Bp = _round_up(B, TM)

    zp = _pad2(z.astype(jnp.float32), Bp, Fp)
    w1 = _pad2(params["W1"].astype(jnp.float32), Fp, Hp).astype(mxu_dtype)
    b1 = _pad2(params["b1"].astype(jnp.float32), 1, Hp)
    w2 = _pad2(params["W2"].astype(jnp.float32), Hp, Hp).astype(mxu_dtype)
    b2 = _pad2(params["b2"].astype(jnp.float32), 1, Hp)
    w3 = _pad2(params["W3"].astype(jnp.float32), Hp, Op).astype(mxu_dtype)
    b3 = _pad2(params["b3"].astype(jnp.float32), 1, Op)

    grid = (Bp // TM,)
    out = pl.pallas_call(
        functools.partial(mlp3_kernel, mxu_dtype=mxu_dtype),
        out_shape=jax.ShapeDtypeStruct((Bp, Op), jnp.float32),
        grid_spec=pltpu.PrefetchScalarGridSpec(
            num_scalar_prefetch=0,
            grid=grid,
            in_specs=[
                pl.BlockSpec((TM, Fp), lambda i: (i, 0)),   # z: tiled by rows
                pl.BlockSpec((Fp, Hp), lambda i: (0, 0)),   # W1: VMEM-resident
                pl.BlockSpec((1, Hp), lambda i: (0, 0)),    # b1
                pl.BlockSpec((Hp, Hp), lambda i: (0, 0)),   # W2
                pl.BlockSpec((1, Hp), lambda i: (0, 0)),    # b2
                pl.BlockSpec((Hp, Op), lambda i: (0, 0)),   # W3
                pl.BlockSpec((1, Op), lambda i: (0, 0)),    # b3
            ],
            out_specs=pl.BlockSpec((TM, Op), lambda i: (i, 0)),
        ),
        compiler_params=pltpu.CompilerParams(
            dimension_semantics=("parallel",)),             # megacore on v7x
    )(zp, w1, b1, w2, b2, w3, b3)
    return out[:B, :O]


# ----------------------------------------------------------------------------
# Pure-JAX reference (exact forward semantics of the PyTorch module)
# ----------------------------------------------------------------------------
def classification_head_ref(z, params):
    x = jnp.maximum(z @ params["W1"] + params["b1"], 0.0)
    x = jnp.maximum(x @ params["W2"] + params["b2"], 0.0)
    return x @ params["W3"] + params["b3"]


def init_params(key, n_latent, nhid, nout):
    keys = jax.random.split(key, 6)

    def lin(kw, kb, fin, fout):
        scale = 1.0 / jnp.sqrt(jnp.float32(fin))
        W = (jax.random.normal(kw, (fin, fout)) * scale).astype(jnp.float32)
        b = (jax.random.normal(kb, (1, fout)) * scale).astype(jnp.float32)
        return W, b

    W1, b1 = lin(keys[0], keys[1], n_latent, nhid)
    W2, b2 = lin(keys[2], keys[3], nhid, nhid)
    W3, b3 = lin(keys[4], keys[5], nhid, nout)
    return dict(W1=W1, b1=b1, W2=W2, b2=b2, W3=W3, b3=b3)


if __name__ == "__main__":
    # Small shapes consistent with the module.
    batch = 16
    n_latent = 32
    nhid = 64
    nout = 8

    key = jax.random.PRNGKey(0)
    kz, kp = jax.random.split(key)
    z = jax.random.normal(kz, (batch, n_latent), dtype=jnp.float32)
    params = init_params(kp, n_latent, nhid, nout)

    ref = classification_head_ref(z, params)

    # f32 MXU-operand path (block_rows=8 -> grid of 2 row blocks).
    out = classification_head_forward(z, params, block_rows=8,
                                      mxu_dtype=jnp.float32)
    out = jax.block_until_ready(out)
    assert out.shape == (batch, nout), out.shape
    assert jnp.allclose(out, ref, rtol=1e-4, atol=1e-4), \
        float(jnp.max(jnp.abs(out - ref)))

    # bf16 MXU-operand path (v6e/v7x MXU throughput), f32 accumulation.
    out_bf16 = classification_head_forward(z, params, block_rows=8,
                                           mxu_dtype=jnp.bfloat16)
    out_bf16 = jax.block_until_ready(out_bf16)
    assert out_bf16.shape == (batch, nout)
    assert jnp.allclose(out_bf16, ref, rtol=0.2, atol=0.2), \
        float(jnp.max(jnp.abs(out_bf16 - ref)))

    print("KERNEL_OK")
</pallas_src>

<mosaic_0001>
module attributes {stable_mosaic.version = 11 : i64} {
  func.func @mlp3_kernel(%arg0: i32, %arg1: memref<8x128xf32, #tpu.memory_space<vmem>>, %arg2: memref<128x128xf32, #tpu.memory_space<vmem>>, %arg3: memref<1x128xf32, #tpu.memory_space<vmem>>, %arg4: memref<128x128xf32, #tpu.memory_space<vmem>>, %arg5: memref<1x128xf32, #tpu.memory_space<vmem>>, %arg6: memref<128x128xf32, #tpu.memory_space<vmem>>, %arg7: memref<1x128xf32, #tpu.memory_space<vmem>>, %arg8: memref<8x128xf32, #tpu.memory_space<vmem>>) attributes {dimension_semantics = [#tpu.dimension_semantics<parallel>], iteration_bounds = array<i64: 2>, scalar_prefetch = 0 : i64, scratch_operands = 0 : i64, tpu.core_type = #tpu.core_type<tc>, window_params = [{transform_indices = @transform_0, window_bounds = array<i64: 8, 128>}, {pipeline_mode = #tpu.pipeline_mode<synchronous>, transform_indices = @transform_1, window_bounds = array<i64: 128, 128>}, {pipeline_mode = #tpu.pipeline_mode<synchronous>, transform_indices = @transform_2, window_bounds = array<i64: 1, 128>}, {pipeline_mode = #tpu.pipeline_mode<synchronous>, transform_indices = @transform_3, window_bounds = array<i64: 128, 128>}, {pipeline_mode = #tpu.pipeline_mode<synchronous>, transform_indices = @transform_4, window_bounds = array<i64: 1, 128>}, {pipeline_mode = #tpu.pipeline_mode<synchronous>, transform_indices = @transform_5, window_bounds = array<i64: 128, 128>}, {pipeline_mode = #tpu.pipeline_mode<synchronous>, transform_indices = @transform_6, window_bounds = array<i64: 1, 128>}, {transform_indices = @transform_7, window_bounds = array<i64: 8, 128>}]} {
    %c0 = arith.constant 0 : index
    %c0_0 = arith.constant 0 : index
    %0 = vector.load %arg1[%c0, %c0_0] : memref<8x128xf32, #tpu.memory_space<vmem>>, vector<8x128xf32>
    %c0_1 = arith.constant 0 : index
    %c0_2 = arith.constant 0 : index
    %1 = vector.load %arg2[%c0_1, %c0_2] : memref<128x128xf32, #tpu.memory_space<vmem>>, vector<128x128xf32>
    %cst = arith.constant dense<0.000000e+00> : vector<8x128xf32>
    %2 = tpu.matmul %0, %1, %cst {dimension_numbers = #tpu.dot_dimension_numbers<[1], [0], [0], [1], [0, 0, 1, 1], [], []>} : vector<8x128xf32>, vector<128x128xf32>, vector<8x128xf32> -> vector<8x128xf32>
    %c0_3 = arith.constant 0 : index
    %c0_4 = arith.constant 0 : index
    %3 = vector.load %arg3[%c0_3, %c0_4] : memref<1x128xf32, #tpu.memory_space<vmem>>, vector<1x128xf32>
    %4 = vector.broadcast %3 : vector<1x128xf32> to vector<8x128xf32>
    %5 = arith.addf %2, %4 : vector<8x128xf32>
    %cst_5 = arith.constant 0.000000e+00 : f32
    %6 = vector.broadcast %cst_5 : f32 to vector<8x128xf32>
    %7 = arith.maximumf %5, %6 : vector<8x128xf32>
    %c0_6 = arith.constant 0 : index
    %c0_7 = arith.constant 0 : index
    %8 = vector.load %arg4[%c0_6, %c0_7] : memref<128x128xf32, #tpu.memory_space<vmem>>, vector<128x128xf32>
    %cst_8 = arith.constant dense<0.000000e+00> : vector<8x128xf32>
    %9 = tpu.matmul %7, %8, %cst_8 {dimension_numbers = #tpu.dot_dimension_numbers<[1], [0], [0], [1], [0, 0, 1, 1], [], []>} : vector<8x128xf32>, vector<128x128xf32>, vector<8x128xf32> -> vector<8x128xf32>
    %c0_9 = arith.constant 0 : index
    %c0_10 = arith.constant 0 : index
    %10 = vector.load %arg5[%c0_9, %c0_10] : memref<1x128xf32, #tpu.memory_space<vmem>>, vector<1x128xf32>
    %11 = vector.broadcast %10 : vector<1x128xf32> to vector<8x128xf32>
    %12 = arith.addf %9, %11 : vector<8x128xf32>
    %cst_11 = arith.constant 0.000000e+00 : f32
    %13 = vector.broadcast %cst_11 : f32 to vector<8x128xf32>
    %14 = arith.maximumf %12, %13 : vector<8x128xf32>
    %c0_12 = arith.constant 0 : index
    %c0_13 = arith.constant 0 : index
    %15 = vector.load %arg6[%c0_12, %c0_13] : memref<128x128xf32, #tpu.memory_space<vmem>>, vector<128x128xf32>
    %cst_14 = arith.constant dense<0.000000e+00> : vector<8x128xf32>
    %16 = tpu.matmul %14, %15, %cst_14 {dimension_numbers = #tpu.dot_dimension_numbers<[1], [0], [0], [1], [0, 0, 1, 1], [], []>} : vector<8x128xf32>, vector<128x128xf32>, vector<8x128xf32> -> vector<8x128xf32>
    %c0_15 = arith.constant 0 : index
    %c0_16 = arith.constant 0 : index
    %17 = vector.load %arg7[%c0_15, %c0_16] : memref<1x128xf32, #tpu.memory_space<vmem>>, vector<1x128xf32>
    %18 = vector.broadcast %17 : vector<1x128xf32> to vector<8x128xf32>
    %19 = arith.addf %16, %18 : vector<8x128xf32>
    %c0_17 = arith.constant 0 : index
    %c0_18 = arith.constant 0 : index
    %20 = vector.load %arg8[%c0_17, %c0_18] : memref<8x128xf32, #tpu.memory_space<vmem>>, vector<8x128xf32>
    tpu.vector_store %arg8[%c0_17, %c0_18], %19 {strides = array<i32>} : memref<8x128xf32, #tpu.memory_space<vmem>>, vector<8x128xf32>,
    return
  }
  func.func @transform_0(%arg0: i32) -> (i32, i32) {
    %c0_i32 = arith.constant 0 : i32
    %c0_i32_0 = arith.constant 0 : i32
    return %arg0, %c0_i32 : i32, i32
  }
  func.func @transform_1(%arg0: i32) -> (i32, i32) {
    %c0_i32 = arith.constant 0 : i32
    %c0_i32_0 = arith.constant 0 : i32
    %c0_i32_1 = arith.constant 0 : i32
    return %c0_i32, %c0_i32_0 : i32, i32
  }
  func.func @transform_2(%arg0: i32) -> (i32, i32) {
    %c0_i32 = arith.constant 0 : i32
    %c0_i32_0 = arith.constant 0 : i32
    %c0_i32_1 = arith.constant 0 : i32
    return %c0_i32, %c0_i32_0 : i32, i32
  }
  func.func @transform_3(%arg0: i32) -> (i32, i32) {
    %c0_i32 = arith.constant 0 : i32
    %c0_i32_0 = arith.constant 0 : i32
    %c0_i32_1 = arith.constant 0 : i32
    return %c0_i32, %c0_i32_0 : i32, i32
  }
  func.func @transform_4(%arg0: i32) -> (i32, i32) {
    %c0_i32 = arith.constant 0 : i32
    %c0_i32_0 = arith.constant 0 : i32
    %c0_i32_1 = arith.constant 0 : i32
    return %c0_i32, %c0_i32_0 : i32, i32
  }
  func.func @transform_5(%arg0: i32) -> (i32, i32) {
    %c0_i32 = arith.constant 0 : i32
    %c0_i32_0 = arith.constant 0 : i32
    %c0_i32_1 = arith.constant 0 : i32
    return %c0_i32, %c0_i32_0 : i32, i32
  }
  func.func @transform_6(%arg0: i32) -> (i32, i32) {
    %c0_i32 = arith.constant 0 : i32
    %c0_i32_0 = arith.constant 0 : i32
    %c0_i32_1 = arith.constant 0 : i32
    return %c0_i32, %c0_i32_0 : i32, i32
  }
  func.func @transform_7(%arg0: i32) -> (i32, i32) {
    %c0_i32 = arith.constant 0 : i32
    %c0_i32_0 = arith.constant 0 : i32
    return %arg0, %c0_i32 : i32, i32
  }
}

</mosaic_0001>

<bundles_post_ra>
// kernel: classification_head_forward.1
= control target key start
LH: loop header
LB: loop body
LE: loop exit
PB: predicated region body
PF: predicated region fallthrough
CT: control target
= control target key end

     0   :  { %s519_s24 = smov 0   ;;  %s700_s0 = inlined_call_operand.vmem [shape: f32[16,128], index: 0, kind: input, shape index: {}]   ;;  %s701_s1 = inlined_call_operand.vmem [shape: f32[128,128], index: 1, kind: input, shape index: {}]   ;;  %s702_s2 = inlined_call_operand.vmem [shape: f32[1,128], index: 2, kind: input, shape index: {}]   ;;  %s703_s3 = inlined_call_operand.vmem [shape: f32[128,128], index: 3, kind: input, shape index: {}]   ;;  %s704_s4 = inlined_call_operand.vmem [shape: f32[1,128], index: 4, kind: input, shape index: {}]   ;;  %s705_s5 = inlined_call_operand.vmem [shape: f32[128,128], index: 5, kind: input, shape index: {}]   ;;  %s706_s6 = inlined_call_operand.vmem [shape: f32[1,128], index: 6, kind: input, shape index: {}]   ;;  %s707_s7 = inlined_call_operand.vmem [shape: f32[16,128], index: 7, kind: output, shape index: {}]  }
   0x1 LB: > { %s451_s25 = sadd.s32 4294967295, %s477_s24   ;;  %p455_p0 = scmp.ge.s32.totalorder %s477_s24, 1  ;;  %s477_s24 = sphi %s519_s24, %s17_s24  }
   0x2   : > { %p236_p1 = scmp.lt.s32.totalorder %s477_s24, 3 }
   0x4   : > { %p237_p2 = pnand %p455_p0, %p236_p1 }
   0x5   : > { %p266_p3 = scmp.lt.s32.totalorder (!%p237_p2), %s451_s25, 1 }
   0x6   : > { %240 = sbr.rel (%p237_p2) target bundleno = 438 (0x1b6), region = 48 }
   0xb   : > { %v290_v0 = vld [vmem:[%s701_s1 + $0x78] sm:$0xff]  ;;  %v289_v1 = vld [vmem:[%s701_s1 + $0x70] sm:$0xff]  ;;  %v288_v2 = vld [vmem:[%s701_s1 + $0x68] sm:$0xff]  ;;  %s709_s25 = smov (!%p266_p3, %s451_s25), 1 }
   0xc   : > { %295 = vmatpush.msra.mxu0 %v290_v0  ;;  %v287_v3 = vld [vmem:[%s701_s1 + $0x60] sm:$0xff]  ;;  %v331_v4 = vld [vmem:[%s703_s3 + $0x78] sm:$0xff]  ;;  %v330_v5 = vld [vmem:[%s703_s3 + $0x70] sm:$0xff]  ;;  %s456_s30 = sshll.u32 %s709_s25, 3 }
   0xd   : > { %v286_v6 = vld [vmem:[%s701_s1 + $0x58] sm:$0xff]  ;;  %336 = vmatpush.msra.mxu1 %v331_v4  ;;  %v329_v7 = vld [vmem:[%s703_s3 + $0x68] sm:$0xff]  ;;  %v285_v8 = vld [vmem:[%s701_s1 + $0x50] sm:$0xff]  ;;  %s269_s18 = scalar_lea.vmem %s700_s0, %s456_s30  ;;  %s273_s9 = scalar_lea.vmem %s707_s7, %s456_s30 }
   0xe   : > { %296 = vmatpush.msra.mxu0 %v289_v1  ;;  %v328_v9 = vld [vmem:[%s703_s3 + $0x60] sm:$0xff]  ;;  %v284_v10 = vld [vmem:[%s701_s1 + $0x48] sm:$0xff]  ;;  %v327_v11 = vld [vmem:[%s703_s3 + $0x58] sm:$0xff] }
   0xf   : > { %337 = vmatpush.msra.mxu1 %v330_v5  ;;  %v283_v12 = vld [vmem:[%s701_s1 + $0x40] sm:$0xff]  ;;  %v326_v13 = vld [vmem:[%s703_s3 + $0x50] sm:$0xff]  ;;  %v282_v14 = vld [vmem:[%s701_s1 + $0x38] sm:$0xff] }
  0x10   : > { %297 = vmatpush.msra.mxu0 %v288_v2  ;;  %v325_v15 = vld [vmem:[%s703_s3 + $0x48] sm:$0xff]  ;;  %v281_v16 = vld [vmem:[%s701_s1 + $0x30] sm:$0xff]  ;;  %v324_v17 = vld [vmem:[%s703_s3 + $0x40] sm:$0xff] }
  0x11   : > { %338 = vmatpush.msra.mxu1 %v329_v7  ;;  %v280_v18 = vld [vmem:[%s701_s1 + $0x28] sm:$0xff]  ;;  %v323_v19 = vld [vmem:[%s703_s3 + $0x38] sm:$0xff]  ;;  %v279_v20 = vld [vmem:[%s701_s1 + $0x20] sm:$0xff] }
  0x12   : > { %298 = vmatpush.msra.mxu0 %v287_v3  ;;  %v322_v21 = vld [vmem:[%s703_s3 + $0x30] sm:$0xff]  ;;  %v278_v22 = vld [vmem:[%s701_s1 + $0x18] sm:$0xff]  ;;  %v321_v23 = vld [vmem:[%s703_s3 + $0x28] sm:$0xff] }
  0x13   : > { %339 = vmatpush.msra.mxu1 %v328_v9  ;;  %v277_v24 = vld [vmem:[%s701_s1 + $0x10] sm:$0xff]  ;;  %v320_v25 = vld [vmem:[%s703_s3 + $0x20] sm:$0xff]  ;;  %v276_v26 = vld [vmem:[%s701_s1 + $0x8] sm:$0xff] }
  0x14   : > { %299 = vmatpush.msra.mxu0 %v286_v6  ;;  %v319_v27 = vld [vmem:[%s703_s3 + $0x18] sm:$0xff]  ;;  %v275_v28 = vld [vmem:[%s701_s1] sm:$0xff]  ;;  %v318_v30 = vld [vmem:[%s703_s3 + $0x10] sm:$0xff] }
  0x15   : > { %340 = vmatpush.msra.mxu1 %v327_v11  ;;  %v274_v29 = vld [vmem:[%s269_s18] sm:$0xff]  ;;  %v317_v31 = vld [vmem:[%s703_s3 + $0x8] sm:$0xff]  ;;  %v372_v33 = vld [vmem:[%s705_s5 + $0x78] sm:$0xff] }
  0x16   : > { %300 = vmatpush.msra.mxu0 %v285_v8  ;;  %v316_v32 = vld [vmem:[%s703_s3] sm:$0xff]  ;;  %v371_v34 = vld [vmem:[%s705_s5 + $0x70] sm:$0xff]  ;;  %377 = vmatpush.msra.mxu2 %v372_v33  ;;  %v370_v35 = vld [vmem:[%s705_s5 + $0x68] sm:$0xff] }
  0x17   : > { %341 = vmatpush.msra.mxu1 %v326_v13  ;;  %v369_v36 = vld [vmem:[%s705_s5 + $0x60] sm:$0xff]  ;;  %v368_v37 = vld [vmem:[%s705_s5 + $0x58] sm:$0xff]  ;;  %v367_v38 = vld [vmem:[%s705_s5 + $0x50] sm:$0xff] }
  0x18   : > { %301 = vmatpush.msra.mxu0 %v284_v10  ;;  %378 = vmatpush.msra.mxu2 %v371_v34  ;;  %v366_v39 = vld [vmem:[%s705_s5 + $0x48] sm:$0xff]  ;;  %v365_v40 = vld [vmem:[%s705_s5 + $0x40] sm:$0xff]  ;;  %v364_v41 = vld [vmem:[%s705_s5 + $0x38] sm:$0xff] }
  0x19   : > { %342 = vmatpush.msra.mxu1 %v325_v15  ;;  %v363_v42 = vld [vmem:[%s705_s5 + $0x30] sm:$0xff]  ;;  %v362_v43 = vld [vmem:[%s705_s5 + $0x28] sm:$0xff]  ;;  %v361_v44 = vld [vmem:[%s705_s5 + $0x20] sm:$0xff] }
  0x1a   : > { %302 = vmatpush.msra.mxu0 %v283_v12  ;;  %379 = vmatpush.msra.mxu2 %v370_v35  ;;  %v360_v45 = vld [vmem:[%s705_s5 + $0x18] sm:$0xff]  ;;  %v468_v46 = vld [vmem:[%s702_s2] ss:$0 sm:$0xff]  ;;  %v359_v50 = vld [vmem:[%s705_s5 + $0x10] sm:$0xff] }
  0x1b   : > { %343 = vmatpush.msra.mxu1 %v324_v17  ;;  %v358_v51 = vld [vmem:[%s705_s5 + $0x8] sm:$0xff]  ;;  %v357_v52 = vld [vmem:[%s705_s5] sm:$0xff] }
  0x1c   : > { %303 = vmatpush.msra.mxu0 %v282_v14  ;;  %380 = vmatpush.msra.mxu2 %v369_v36  ;;  %v469_v53 = vld [vmem:[%s704_s4] ss:$0 sm:$0xff] }
  0x1d   : > { %344 = vmatpush.msra.mxu1 %v323_v19  ;;  %v470_v57 = vld [vmem:[%s706_s6] ss:$0 sm:$0xff] }
  0x1e   : > { %304 = vmatpush.msra.mxu0 %v281_v16  ;;  %381 = vmatpush.msra.mxu2 %v368_v37 }
  0x1f   : > { %345 = vmatpush.msra.mxu1 %v322_v21 }
  0x20   : > { %305 = vmatpush.msra.mxu0 %v280_v18  ;;  %382 = vmatpush.msra.mxu2 %v367_v38 }
  0x21   : > { %346 = vmatpush.msra.mxu1 %v321_v23 }
  0x22   : > { %306 = vmatpush.msra.mxu0 %v279_v20  ;;  %383 = vmatpush.msra.mxu2 %v366_v39 }
  0x23   : > { %347 = vmatpush.msra.mxu1 %v320_v25 }
  0x24   : > { %307 = vmatpush.msra.mxu0 %v278_v22  ;;  %384 = vmatpush.msra.mxu2 %v365_v40 }
  0x25   : > { %348 = vmatpush.msra.mxu1 %v319_v27 }
  0x26   : > { %308 = vmatpush.msra.mxu0 %v277_v24  ;;  %385 = vmatpush.msra.mxu2 %v364_v41 }
  0x27   : > { %349 = vmatpush.msra.mxu1 %v318_v30 }
  0x28   : > { %309 = vmatpush.msra.mxu0 %v276_v26  ;;  %386 = vmatpush.msra.mxu2 %v363_v42 }
  0x29   : > { %350 = vmatpush.msra.mxu1 %v317_v31 }
  0x2a   : > { %310 = vmatpush.msra.mxu0 %v275_v28  ;;  %387 = vmatpush.msra.mxu2 %v362_v43 }
  0x2b   : > { %311 = vmatmul.f32.vlgmr.msra.gmra.mxu0 %v274_v29  ;;  %351 = vmatpush.msra.mxu1 %v316_v32 }
  0x2c   : > { %388 = vmatpush.msra.mxu2 %v361_v44 }
  0x2e   : > { %389 = vmatpush.msra.mxu2 %v360_v45 }
  0x30   : > { %390 = vmatpush.msra.mxu2 %v359_v50 }
  0x32   : > { %391 = vmatpush.msra.mxu2 %v358_v51 }
  0x34   : > { %392 = vmatpush.msra.mxu2 %v357_v52 }
  0xa8   : > { %v312_v47 = vpop.f32.mrf.mxu0 }
  0xa9   : > { %v313_v48 = vadd.f32 %v468_v46, %v312_v47 }
  0xab   : > { %v315_v49 = vmax.f32 %v313_v48, 0.0 }
  0xad   : > { %352 = vmatmul.f32.vlgmr.msra.gmra.mxu1 %v315_v49 }
 0x12a   : > { %v353_v54 = vpop.f32.mrf.mxu1 }
 0x12b   : > { %v354_v55 = vadd.f32 %v469_v53, %v353_v54 }
 0x12d   : > { %v356_v56 = vmax.f32 %v354_v55, 0.0 }
 0x12f   : > { %393 = vmatmul.f32.vlgmr.msra.gmra.mxu2 %v356_v56 }
 0x1b2   : > { %v394_v58 = vpop.f32.mrf.mxu2 }
 0x1b3   : > { %v395_v59 = vadd.f32 %v470_v57, %v394_v58 }
 0x1b5   : > { %397 = vst [vmem:[%s273_s9] sm:$0xff] %v395_v59 }
 0x1b6 PF: > { %s17_s24 = sadd.s32 1, %s477_s24  }
 0x1b7   : > { %p14_p4 = scmp.ge.s32.totalorder %s17_s24, 4  }
 0x1b9   :  { %16 = sbr.rel (!%p14_p4) target bundleno = 1 (0x1), region = 78 }

</bundles_post_ra>
